<compile_context>
chip_gen: v5e
topology: v5e:2x2
jax: 0.10.0
libtpu: 0.0.40
codegen_flags: <defaults>
</compile_context>

<pallas_src>
import jax
import jax.numpy as jnp
from jax import lax
from jax.experimental import pallas as pl
from jax.experimental.pallas import tpu as pltpu


def _make_kernel(T, BB, H):
    """Kernel factory closing over the static problem sizes."""
    R_IH0, R_IH1 = 0, 8                  # [w_ih ; bias] rows (zero-padded to 8)
    R_HH0, R_HH1 = 8, 8 + H              # w_hh rows
    R_DE0, R_DE1 = 8 + H, 8 + 2 * H      # decoder weight rows (lane-padded)
    R_BD = 8 + 2 * H                     # decoder bias row

    def kernel(x_ref, w_ref, out_ref, hs_ref):
        # x_ref  : (1, T*BB, 8)       time-major rows; column I is the ones column
        # w_ref  : (8 + 2H + 8, 4H)   packed [w_ih|b ; w_hh ; w_dec_pad ; b_dec_pad]
        # out_ref: (1, T*BB, 4H)      lane-dense decoder output (cols >= I are zero)
        # hs_ref : (T*BB, H)          VMEM scratch for the hidden states
        wih = w_ref[R_IH0:R_IH1, :]        # (8, 4H)   bias folded in as a row
        whh = w_ref[R_HH0:R_HH1, :]        # (H, 4H)   g-columns pre-scaled by 2
        wdec = w_ref[R_DE0:R_DE1, :]       # (H, 4H)   zero-padded past col I
        bdec = w_ref[R_BD:R_BD + 1, :]     # (1, 4H)

        # Hoisted input projection: one MXU matmul for all T*BB rows, bias
        # included via the ones column of x.
        zx = jnp.dot(x_ref[0], wih, preferred_element_type=jnp.float32)  # (T*BB, 4H)

        h = jnp.zeros((BB, H), jnp.float32)
        c = jnp.zeros((BB, H), jnp.float32)

        # Fully unrolled recurrence: one matmul + one full-width sigmoid pass
        # per step sit on the serial critical path.
        for t in range(T):
            z = zx[t * BB:(t + 1) * BB, :] + jnp.dot(
                h, whh, preferred_element_type=jnp.float32
            )  # (BB, 4H)
            sig = jax.nn.sigmoid(z)                     # single EUP pass over 4H lanes
            i_g = sig[:, 0 * H:1 * H]
            f_g = sig[:, 1 * H:2 * H]
            g_g = 2.0 * sig[:, 2 * H:3 * H] - 1.0       # tanh(x) = 2*sigmoid(2x) - 1
            o_g = sig[:, 3 * H:4 * H]
            c = f_g * c + i_g * g_g
            h = o_g * jnp.tanh(c)
            hs_ref[t * BB:(t + 1) * BB, :] = h          # off the carry chain

        # Hoisted decoder: one matmul + one unmasked lane-dense store.
        # Dropout(0.2) is identity in eval mode.
        dec = jnp.dot(hs_ref[...], wdec, preferred_element_type=jnp.float32) + bdec
        out_ref[0] = dec.astype(out_ref.dtype)

    return kernel


def _forward(x, params):
    """x: (B, T, I) batch_first, like the PyTorch module.  Returns (B, T, I)."""
    B, T, I = x.shape
    H = params["w_hh"].shape[1]          # w_hh: (4H, H)
    assert I < 8, "input_size must fit the 8-lane augmented input block"
    assert H % 32 == 0, "hidden_size must keep 4H a multiple of 128 lanes"
    W = 4 * H

    # Batch padding / blocking: fill sublanes (8), grow block rows with batch
    # (up to 128) to fill MXU M, split blocks across TCs on v7x via "parallel".
    B_pad = -(-B // 8) * 8
    BB = min(B_pad, 128)
    B_pad = -(-B_pad // BB) * BB
    nb = B_pad // BB

    # g-gate pre-activation scaled by 2 so tanh is recovered from the shared
    # sigmoid pass (tanh(x) = 2*sigmoid(2x) - 1).
    gate_scale = jnp.ones((W,), jnp.float32).at[2 * H:3 * H].set(2.0)
    w_ih_t = params["w_ih"].T.astype(jnp.float32) * gate_scale            # (I, W)
    w_hh_t = params["w_hh"].T.astype(jnp.float32) * gate_scale            # (H, W)
    bias = (params["b_ih"] + params["b_hh"]).astype(jnp.float32) * gate_scale
    w_dec_t = params["w_dec"].T.astype(jnp.float32)                       # (H, I)
    b_dec = params["b_dec"].astype(jnp.float32)                           # (I,)

    # Single packed, lane-dense weight block: (8 + 2H + 8, W).
    wih_blk = jnp.zeros((8, W), jnp.float32).at[:I, :].set(w_ih_t).at[I, :].set(bias)
    wdec_blk = jnp.zeros((H, W), jnp.float32).at[:, :I].set(w_dec_t)
    bdec_blk = jnp.zeros((8, W), jnp.float32).at[0, :I].set(b_dec)
    w_pack = jnp.concatenate([wih_blk, w_hh_t, wdec_blk, bdec_blk], axis=0)

    # x -> time-major, batch padded, ones column appended (bias), lanes -> 8.
    x_tm = jnp.transpose(x, (1, 0, 2)).astype(jnp.float32)                # (T, B, I)
    x_tm = jnp.pad(x_tm, ((0, 0), (0, B_pad - B), (0, 0)))                # (T, B_pad, I)
    x_aug = jnp.concatenate(
        [x_tm,
         jnp.ones((T, B_pad, 1), jnp.float32),
         jnp.zeros((T, B_pad, 8 - I - 1), jnp.float32)],
        axis=-1,
    )                                                                     # (T, B_pad, 8)
    x_aug = (
        x_aug.reshape(T, nb, BB, 8).transpose(1, 0, 2, 3).reshape(nb, T * BB, 8)
    )

    out = pl.pallas_call(
        _make_kernel(T, BB, H),
        out_shape=jax.ShapeDtypeStruct((nb, T * BB, W), jnp.float32),
        grid=(nb,),
        in_specs=[
            pl.BlockSpec((1, T * BB, 8), lambda b: (b, 0, 0)),
            pl.BlockSpec((16 + 2 * H, W), lambda b: (0, 0)),
        ],
        out_specs=pl.BlockSpec((1, T * BB, W), lambda b: (b, 0, 0)),
        scratch_shapes=[pltpu.VMEM((T * BB, H), jnp.float32)],
        compiler_params=pltpu.CompilerParams(
            dimension_semantics=("parallel",)),
    )(x_aug, w_pack)                                                      # (nb, T*BB, W)

    out = (
        out.reshape(nb, T, BB, W).transpose(1, 0, 2, 3).reshape(T, B_pad, W)[:, :B, :I]
    )
    return jnp.transpose(out, (1, 0, 2))                                  # (B, T, I)


# Everything (pre/post-processing + pallas_call) under one jit so XLA fuses
# the tiny transpose/pad/slice ops into the operand/result copies.
lstm_anomaly_detector = jax.jit(_forward)


def init_params(key, input_size=3, hidden_size=32):
    """Deterministic init mimicking PyTorch: U(-1/sqrt(H), 1/sqrt(H))."""
    k = 1.0 / jnp.sqrt(jnp.float32(hidden_size))
    keys = jax.random.split(key, 6)
    u = lambda kk, shape: jax.random.uniform(kk, shape, jnp.float32, -k, k)
    return {
        "w_ih": u(keys[0], (4 * hidden_size, input_size)),
        "w_hh": u(keys[1], (4 * hidden_size, hidden_size)),
        "b_ih": u(keys[2], (4 * hidden_size,)),
        "b_hh": u(keys[3], (4 * hidden_size,)),
        "w_dec": u(keys[4], (input_size, hidden_size)),
        "b_dec": u(keys[5], (input_size,)),
    }


def reference_forward(x, params):
    """Pure-JAX reference with identical PyTorch LSTM semantics (for checking)."""
    B, T, I = x.shape
    H = params["w_hh"].shape[1]
    wih, whh = params["w_ih"], params["w_hh"]
    b = params["b_ih"] + params["b_hh"]

    def step(carry, x_t):
        h, c = carry
        z = x_t @ wih.T + h @ whh.T + b
        i_g = jax.nn.sigmoid(z[:, 0 * H:1 * H])
        f_g = jax.nn.sigmoid(z[:, 1 * H:2 * H])
        g_g = jnp.tanh(z[:, 2 * H:3 * H])
        o_g = jax.nn.sigmoid(z[:, 3 * H:4 * H])
        c_new = f_g * c + i_g * g_g
        h_new = o_g * jnp.tanh(c_new)
        return (h_new, c_new), h_new

    x_tm = jnp.transpose(x, (1, 0, 2))
    (_, _), hs = lax.scan(step, (jnp.zeros((B, H)), jnp.zeros((B, H))), x_tm)
    hs = jnp.transpose(hs, (1, 0, 2))                    # (B, T, H)
    return hs @ params["w_dec"].T + params["b_dec"]      # (B, T, I)


if __name__ == "__main__":
    key = jax.random.PRNGKey(0)
    k_x, k_p = jax.random.split(key)

    B, T, I, H = 2, 8, 3, 32
    x = jax.random.normal(k_x, (B, T, I), jnp.float32)
    params = init_params(k_p, input_size=I, hidden_size=H)

    out = jax.block_until_ready(lstm_anomaly_detector(x, params))
    ref = jax.block_until_ready(reference_forward(x, params))

    assert out.shape == (B, T, I), out.shape
    # tanh(x) = 2*sigmoid(2x) - 1 is an exact identity; the shared-sigmoid gate
    # trick only adds float-level (~1e-6) deviation vs. the tanh-based ref.
    assert jnp.allclose(out, ref, atol=1e-4, rtol=1e-4), float(
        jnp.max(jnp.abs(out - ref)))
    print("KERNEL_OK")
</pallas_src>

<mosaic_0001>
module attributes {stable_mosaic.version = 11 : i64} {
  func.func @kernel(%arg0: i32, %arg1: memref<1x64x8xf32, #tpu.memory_space<vmem>>, %arg2: memref<80x128xf32, #tpu.memory_space<vmem>>, %arg3: memref<1x64x128xf32, #tpu.memory_space<vmem>>, %arg4: memref<64x32xf32, #tpu.memory_space<vmem>>) attributes {dimension_semantics = [#tpu.dimension_semantics<parallel>], iteration_bounds = array<i64: 1>, scalar_prefetch = 0 : i64, scratch_operands = 1 : i64, tpu.core_type = #tpu.core_type<tc>, window_params = [{transform_indices = @transform_0, window_bounds = array<i64: 1, 64, 8>}, {pipeline_mode = #tpu.pipeline_mode<synchronous>, transform_indices = @transform_1, window_bounds = array<i64: 80, 128>}, {transform_indices = @transform_2, window_bounds = array<i64: 1, 64, 128>}]} {
    %c0 = arith.constant 0 : index
    %c0_0 = arith.constant 0 : index
    %0 = vector.load %arg2[%c0, %c0_0] : memref<80x128xf32, #tpu.memory_space<vmem>>, vector<8x128xf32>
    %c8 = arith.constant 8 : index
    %c0_1 = arith.constant 0 : index
    %1 = vector.load %arg2[%c8, %c0_1] : memref<80x128xf32, #tpu.memory_space<vmem>>, vector<32x128xf32>
    %c40 = arith.constant 40 : index
    %c0_2 = arith.constant 0 : index
    %2 = vector.load %arg2[%c40, %c0_2] : memref<80x128xf32, #tpu.memory_space<vmem>>, vector<32x128xf32>
    %c72 = arith.constant 72 : index
    %c0_3 = arith.constant 0 : index
    %3 = vector.load %arg2[%c72, %c0_3] : memref<80x128xf32, #tpu.memory_space<vmem>>, vector<1x128xf32>
    %c0_4 = arith.constant 0 : index
    %c0_5 = arith.constant 0 : index
    %c0_6 = arith.constant 0 : index
    %4 = vector.load %arg1[%c0_4, %c0_5, %c0_6] : memref<1x64x8xf32, #tpu.memory_space<vmem>>, vector<1x64x8xf32>
    %5 = vector.shape_cast %4 : vector<1x64x8xf32> to vector<64x8xf32>
    %cst = arith.constant dense<0.000000e+00> : vector<64x128xf32>
    %6 = tpu.matmul %5, %0, %cst {dimension_numbers = #tpu.dot_dimension_numbers<[1], [0], [0], [1], [0, 0, 1, 1], [], []>} : vector<64x8xf32>, vector<8x128xf32>, vector<64x128xf32> -> vector<64x128xf32>
    %cst_7 = arith.constant 0.000000e+00 : f32
    %7 = vector.broadcast %cst_7 : f32 to vector<8x32xf32>
    %cst_8 = arith.constant 0.000000e+00 : f32
    %8 = vector.broadcast %cst_8 : f32 to vector<8x32xf32>
    %9 = vector.extract_strided_slice %6 {offsets = [0, 0], sizes = [8, 128], strides = [1, 1]} : vector<64x128xf32> to vector<8x128xf32>
    %cst_9 = arith.constant dense<0.000000e+00> : vector<8x128xf32>
    %10 = tpu.matmul %7, %1, %cst_9 {dimension_numbers = #tpu.dot_dimension_numbers<[1], [0], [0], [1], [0, 0, 1, 1], [], []>} : vector<8x32xf32>, vector<32x128xf32>, vector<8x128xf32> -> vector<8x128xf32>
    %11 = arith.addf %9, %10 : vector<8x128xf32>
    %12 = arith.negf %11 : vector<8x128xf32>
    %13 = math.exp %12 : vector<8x128xf32>
    %cst_10 = arith.constant 1.000000e+00 : f32
    %14 = vector.broadcast %cst_10 : f32 to vector<8x128xf32>
    %15 = arith.addf %14, %13 : vector<8x128xf32>
    %16 = arith.divf %14, %15 : vector<8x128xf32>
    %17 = vector.extract_strided_slice %16 {offsets = [0, 0], sizes = [8, 32], strides = [1, 1]} : vector<8x128xf32> to vector<8x32xf32>
    %18 = vector.extract_strided_slice %16 {offsets = [0, 32], sizes = [8, 32], strides = [1, 1]} : vector<8x128xf32> to vector<8x32xf32>
    %19 = vector.extract_strided_slice %16 {offsets = [0, 64], sizes = [8, 32], strides = [1, 1]} : vector<8x128xf32> to vector<8x32xf32>
    %cst_11 = arith.constant 2.000000e+00 : f32
    %20 = vector.broadcast %cst_11 : f32 to vector<8x32xf32>
    %21 = arith.mulf %20, %19 : vector<8x32xf32>
    %cst_12 = arith.constant 1.000000e+00 : f32
    %22 = vector.broadcast %cst_12 : f32 to vector<8x32xf32>
    %23 = arith.subf %21, %22 : vector<8x32xf32>
    %24 = vector.extract_strided_slice %16 {offsets = [0, 96], sizes = [8, 32], strides = [1, 1]} : vector<8x128xf32> to vector<8x32xf32>
    %25 = arith.mulf %18, %8 : vector<8x32xf32>
    %26 = arith.mulf %17, %23 : vector<8x32xf32>
    %27 = arith.addf %25, %26 : vector<8x32xf32>
    %28 = math.tanh %27 : vector<8x32xf32>
    %29 = arith.mulf %24, %28 : vector<8x32xf32>
    %c0_13 = arith.constant 0 : index
    %c0_14 = arith.constant 0 : index
    %30 = vector.load %arg4[%c0_13, %c0_14] : memref<64x32xf32, #tpu.memory_space<vmem>>, vector<8x32xf32>
    tpu.vector_store %arg4[%c0_13, %c0_14], %29 {strides = array<i32>} : memref<64x32xf32, #tpu.memory_space<vmem>>, vector<8x32xf32>,
    %31 = vector.extract_strided_slice %6 {offsets = [8, 0], sizes = [8, 128], strides = [1, 1]} : vector<64x128xf32> to vector<8x128xf32>
    %cst_15 = arith.constant dense<0.000000e+00> : vector<8x128xf32>
    %32 = tpu.matmul %29, %1, %cst_15 {dimension_numbers = #tpu.dot_dimension_numbers<[1], [0], [0], [1], [0, 0, 1, 1], [], []>} : vector<8x32xf32>, vector<32x128xf32>, vector<8x128xf32> -> vector<8x128xf32>
    %33 = arith.addf %31, %32 : vector<8x128xf32>
    %34 = arith.negf %33 : vector<8x128xf32>
    %35 = math.exp %34 : vector<8x128xf32>
    %cst_16 = arith.constant 1.000000e+00 : f32
    %36 = vector.broadcast %cst_16 : f32 to vector<8x128xf32>
    %37 = arith.addf %36, %35 : vector<8x128xf32>
    %38 = arith.divf %36, %37 : vector<8x128xf32>
    %39 = vector.extract_strided_slice %38 {offsets = [0, 0], sizes = [8, 32], strides = [1, 1]} : vector<8x128xf32> to vector<8x32xf32>
    %40 = vector.extract_strided_slice %38 {offsets = [0, 32], sizes = [8, 32], strides = [1, 1]} : vector<8x128xf32> to vector<8x32xf32>
    %41 = vector.extract_strided_slice %38 {offsets = [0, 64], sizes = [8, 32], strides = [1, 1]} : vector<8x128xf32> to vector<8x32xf32>
    %cst_17 = arith.constant 2.000000e+00 : f32
    %42 = vector.broadcast %cst_17 : f32 to vector<8x32xf32>
    %43 = arith.mulf %42, %41 : vector<8x32xf32>
    %cst_18 = arith.constant 1.000000e+00 : f32
    %44 = vector.broadcast %cst_18 : f32 to vector<8x32xf32>
    %45 = arith.subf %43, %44 : vector<8x32xf32>
    %46 = vector.extract_strided_slice %38 {offsets = [0, 96], sizes = [8, 32], strides = [1, 1]} : vector<8x128xf32> to vector<8x32xf32>
    %47 = arith.mulf %40, %27 : vector<8x32xf32>
    %48 = arith.mulf %39, %45 : vector<8x32xf32>
    %49 = arith.addf %47, %48 : vector<8x32xf32>
    %50 = math.tanh %49 : vector<8x32xf32>
    %51 = arith.mulf %46, %50 : vector<8x32xf32>
    %c8_19 = arith.constant 8 : index
    %c0_20 = arith.constant 0 : index
    %52 = vector.load %arg4[%c8_19, %c0_20] : memref<64x32xf32, #tpu.memory_space<vmem>>, vector<8x32xf32>
    tpu.vector_store %arg4[%c8_19, %c0_20], %51 {strides = array<i32>} : memref<64x32xf32, #tpu.memory_space<vmem>>, vector<8x32xf32>,
    %53 = vector.extract_strided_slice %6 {offsets = [16, 0], sizes = [8, 128], strides = [1, 1]} : vector<64x128xf32> to vector<8x128xf32>
    %cst_21 = arith.constant dense<0.000000e+00> : vector<8x128xf32>
    %54 = tpu.matmul %51, %1, %cst_21 {dimension_numbers = #tpu.dot_dimension_numbers<[1], [0], [0], [1], [0, 0, 1, 1], [], []>} : vector<8x32xf32>, vector<32x128xf32>, vector<8x128xf32> -> vector<8x128xf32>
    %55 = arith.addf %53, %54 : vector<8x128xf32>
    %56 = arith.negf %55 : vector<8x128xf32>
    %57 = math.exp %56 : vector<8x128xf32>
    %cst_22 = arith.constant 1.000000e+00 : f32
    %58 = vector.broadcast %cst_22 : f32 to vector<8x128xf32>
    %59 = arith.addf %58, %57 : vector<8x128xf32>
    %60 = arith.divf %58, %59 : vector<8x128xf32>
    %61 = vector.extract_strided_slice %60 {offsets = [0, 0], sizes = [8, 32], strides = [1, 1]} : vector<8x128xf32> to vector<8x32xf32>
    %62 = vector.extract_strided_slice %60 {offsets = [0, 32], sizes = [8, 32], strides = [1, 1]} : vector<8x128xf32> to vector<8x32xf32>
    %63 = vector.extract_strided_slice %60 {offsets = [0, 64], sizes = [8, 32], strides = [1, 1]} : vector<8x128xf32> to vector<8x32xf32>
    %cst_23 = arith.constant 2.000000e+00 : f32
    %64 = vector.broadcast %cst_23 : f32 to vector<8x32xf32>
    %65 = arith.mulf %64, %63 : vector<8x32xf32>
    %cst_24 = arith.constant 1.000000e+00 : f32
    %66 = vector.broadcast %cst_24 : f32 to vector<8x32xf32>
    %67 = arith.subf %65, %66 : vector<8x32xf32>
    %68 = vector.extract_strided_slice %60 {offsets = [0, 96], sizes = [8, 32], strides = [1, 1]} : vector<8x128xf32> to vector<8x32xf32>
    %69 = arith.mulf %62, %49 : vector<8x32xf32>
    %70 = arith.mulf %61, %67 : vector<8x32xf32>
    %71 = arith.addf %69, %70 : vector<8x32xf32>
    %72 = math.tanh %71 : vector<8x32xf32>
    %73 = arith.mulf %68, %72 : vector<8x32xf32>
    %c16 = arith.constant 16 : index
    %c0_25 = arith.constant 0 : index
    %74 = vector.load %arg4[%c16, %c0_25] : memref<64x32xf32, #tpu.memory_space<vmem>>, vector<8x32xf32>
    tpu.vector_store %arg4[%c16, %c0_25], %73 {strides = array<i32>} : memref<64x32xf32, #tpu.memory_space<vmem>>, vector<8x32xf32>,
    %75 = vector.extract_strided_slice %6 {offsets = [24, 0], sizes = [8, 128], strides = [1, 1]} : vector<64x128xf32> to vector<8x128xf32>
    %cst_26 = arith.constant dense<0.000000e+00> : vector<8x128xf32>
    %76 = tpu.matmul %73, %1, %cst_26 {dimension_numbers = #tpu.dot_dimension_numbers<[1], [0], [0], [1], [0, 0, 1, 1], [], []>} : vector<8x32xf32>, vector<32x128xf32>, vector<8x128xf32> -> vector<8x128xf32>
    %77 = arith.addf %75, %76 : vector<8x128xf32>
    %78 = arith.negf %77 : vector<8x128xf32>
    %79 = math.exp %78 : vector<8x128xf32>
    %cst_27 = arith.constant 1.000000e+00 : f32
    %80 = vector.broadcast %cst_27 : f32 to vector<8x128xf32>
    %81 = arith.addf %80, %79 : vector<8x128xf32>
    %82 = arith.divf %80, %81 : vector<8x128xf32>
    %83 = vector.extract_strided_slice %82 {offsets = [0, 0], sizes = [8, 32], strides = [1, 1]} : vector<8x128xf32> to vector<8x32xf32>
    %84 = vector.extract_strided_slice %82 {offsets = [0, 32], sizes = [8, 32], strides = [1, 1]} : vector<8x128xf32> to vector<8x32xf32>
    %85 = vector.extract_strided_slice %82 {offsets = [0, 64], sizes = [8, 32], strides = [1, 1]} : vector<8x128xf32> to vector<8x32xf32>
    %cst_28 = arith.constant 2.000000e+00 : f32
    %86 = vector.broadcast %cst_28 : f32 to vector<8x32xf32>
    %87 = arith.mulf %86, %85 : vector<8x32xf32>
    %cst_29 = arith.constant 1.000000e+00 : f32
    %88 = vector.broadcast %cst_29 : f32 to vector<8x32xf32>
    %89 = arith.subf %87, %88 : vector<8x32xf32>
    %90 = vector.extract_strided_slice %82 {offsets = [0, 96], sizes = [8, 32], strides = [1, 1]} : vector<8x128xf32> to vector<8x32xf32>
    %91 = arith.mulf %84, %71 : vector<8x32xf32>
    %92 = arith.mulf %83, %89 : vector<8x32xf32>
    %93 = arith.addf %91, %92 : vector<8x32xf32>
    %94 = math.tanh %93 : vector<8x32xf32>
    %95 = arith.mulf %90, %94 : vector<8x32xf32>
    %c24 = arith.constant 24 : index
    %c0_30 = arith.constant 0 : index
    %96 = vector.load %arg4[%c24, %c0_30] : memref<64x32xf32, #tpu.memory_space<vmem>>, vector<8x32xf32>
    tpu.vector_store %arg4[%c24, %c0_30], %95 {strides = array<i32>} : memref<64x32xf32, #tpu.memory_space<vmem>>, vector<8x32xf32>,
    %97 = vector.extract_strided_slice %6 {offsets = [32, 0], sizes = [8, 128], strides = [1, 1]} : vector<64x128xf32> to vector<8x128xf32>
    %cst_31 = arith.constant dense<0.000000e+00> : vector<8x128xf32>
    %98 = tpu.matmul %95, %1, %cst_31 {dimension_numbers = #tpu.dot_dimension_numbers<[1], [0], [0], [1], [0, 0, 1, 1], [], []>} : vector<8x32xf32>, vector<32x128xf32>, vector<8x128xf32> -> vector<8x128xf32>
    %99 = arith.addf %97, %98 : vector<8x128xf32>
    %100 = arith.negf %99 : vector<8x128xf32>
    %101 = math.exp %100 : vector<8x128xf32>
    %cst_32 = arith.constant 1.000000e+00 : f32
    %102 = vector.broadcast %cst_32 : f32 to vector<8x128xf32>
    %103 = arith.addf %102, %101 : vector<8x128xf32>
    %104 = arith.divf %102, %103 : vector<8x128xf32>
    %105 = vector.extract_strided_slice %104 {offsets = [0, 0], sizes = [8, 32], strides = [1, 1]} : vector<8x128xf32> to vector<8x32xf32>
    %106 = vector.extract_strided_slice %104 {offsets = [0, 32], sizes = [8, 32], strides = [1, 1]} : vector<8x128xf32> to vector<8x32xf32>
    %107 = vector.extract_strided_slice %104 {offsets = [0, 64], sizes = [8, 32], strides = [1, 1]} : vector<8x128xf32> to vector<8x32xf32>
    %cst_33 = arith.constant 2.000000e+00 : f32
    %108 = vector.broadcast %cst_33 : f32 to vector<8x32xf32>
    %109 = arith.mulf %108, %107 : vector<8x32xf32>
    %cst_34 = arith.constant 1.000000e+00 : f32
    %110 = vector.broadcast %cst_34 : f32 to vector<8x32xf32>
    %111 = arith.subf %109, %110 : vector<8x32xf32>
    %112 = vector.extract_strided_slice %104 {offsets = [0, 96], sizes = [8, 32], strides = [1, 1]} : vector<8x128xf32> to vector<8x32xf32>
    %113 = arith.mulf %106, %93 : vector<8x32xf32>
    %114 = arith.mulf %105, %111 : vector<8x32xf32>
    %115 = arith.addf %113, %114 : vector<8x32xf32>
    %116 = math.tanh %115 : vector<8x32xf32>
    %117 = arith.mulf %112, %116 : vector<8x32xf32>
    %c32 = arith.constant 32 : index
    %c0_35 = arith.constant 0 : index
    %118 = vector.load %arg4[%c32, %c0_35] : memref<64x32xf32, #tpu.memory_space<vmem>>, vector<8x32xf32>
    tpu.vector_store %arg4[%c32, %c0_35], %117 {strides = array<i32>} : memref<64x32xf32, #tpu.memory_space<vmem>>, vector<8x32xf32>,
    %119 = vector.extract_strided_slice %6 {offsets = [40, 0], sizes = [8, 128], strides = [1, 1]} : vector<64x128xf32> to vector<8x128xf32>
    %cst_36 = arith.constant dense<0.000000e+00> : vector<8x128xf32>
    %120 = tpu.matmul %117, %1, %cst_36 {dimension_numbers = #tpu.dot_dimension_numbers<[1], [0], [0], [1], [0, 0, 1, 1], [], []>} : vector<8x32xf32>, vector<32x128xf32>, vector<8x128xf32> -> vector<8x128xf32>
    %121 = arith.addf %119, %120 : vector<8x128xf32>
    %122 = arith.negf %121 : vector<8x128xf32>
    %123 = math.exp %122 : vector<8x128xf32>
    %cst_37 = arith.constant 1.000000e+00 : f32
    %124 = vector.broadcast %cst_37 : f32 to vector<8x128xf32>
    %125 = arith.addf %124, %123 : vector<8x128xf32>
    %126 = arith.divf %124, %125 : vector<8x128xf32>
    %127 = vector.extract_strided_slice %126 {offsets = [0, 0], sizes = [8, 32], strides = [1, 1]} : vector<8x128xf32> to vector<8x32xf32>
    %128 = vector.extract_strided_slice %126 {offsets = [0, 32], sizes = [8, 32], strides = [1, 1]} : vector<8x128xf32> to vector<8x32xf32>
    %129 = vector.extract_strided_slice %126 {offsets = [0, 64], sizes = [8, 32], strides = [1, 1]} : vector<8x128xf32> to vector<8x32xf32>
    %cst_38 = arith.constant 2.000000e+00 : f32
    %130 = vector.broadcast %cst_38 : f32 to vector<8x32xf32>
    %131 = arith.mulf %130, %129 : vector<8x32xf32>
    %cst_39 = arith.constant 1.000000e+00 : f32
    %132 = vector.broadcast %cst_39 : f32 to vector<8x32xf32>
    %133 = arith.subf %131, %132 : vector<8x32xf32>
    %134 = vector.extract_strided_slice %126 {offsets = [0, 96], sizes = [8, 32], strides = [1, 1]} : vector<8x128xf32> to vector<8x32xf32>
    %135 = arith.mulf %128, %115 : vector<8x32xf32>
    %136 = arith.mulf %127, %133 : vector<8x32xf32>
    %137 = arith.addf %135, %136 : vector<8x32xf32>
    %138 = math.tanh %137 : vector<8x32xf32>
    %139 = arith.mulf %134, %138 : vector<8x32xf32>
    %c40_40 = arith.constant 40 : index
    %c0_41 = arith.constant 0 : index
    %140 = vector.load %arg4[%c40_40, %c0_41] : memref<64x32xf32, #tpu.memory_space<vmem>>, vector<8x32xf32>
    tpu.vector_store %arg4[%c40_40, %c0_41], %139 {strides = array<i32>} : memref<64x32xf32, #tpu.memory_space<vmem>>, vector<8x32xf32>,
    %141 = vector.extract_strided_slice %6 {offsets = [48, 0], sizes = [8, 128], strides = [1, 1]} : vector<64x128xf32> to vector<8x128xf32>
    %cst_42 = arith.constant dense<0.000000e+00> : vector<8x128xf32>
    %142 = tpu.matmul %139, %1, %cst_42 {dimension_numbers = #tpu.dot_dimension_numbers<[1], [0], [0], [1], [0, 0, 1, 1], [], []>} : vector<8x32xf32>, vector<32x128xf32>, vector<8x128xf32> -> vector<8x128xf32>
    %143 = arith.addf %141, %142 : vector<8x128xf32>
    %144 = arith.negf %143 : vector<8x128xf32>
    %145 = math.exp %144 : vector<8x128xf32>
    %cst_43 = arith.constant 1.000000e+00 : f32
    %146 = vector.broadcast %cst_43 : f32 to vector<8x128xf32>
    %147 = arith.addf %146, %145 : vector<8x128xf32>
    %148 = arith.divf %146, %147 : vector<8x128xf32>
    %149 = vector.extract_strided_slice %148 {offsets = [0, 0], sizes = [8, 32], strides = [1, 1]} : vector<8x128xf32> to vector<8x32xf32>
    %150 = vector.extract_strided_slice %148 {offsets = [0, 32], sizes = [8, 32], strides = [1, 1]} : vector<8x128xf32> to vector<8x32xf32>
    %151 = vector.extract_strided_slice %148 {offsets = [0, 64], sizes = [8, 32], strides = [1, 1]} : vector<8x128xf32> to vector<8x32xf32>
    %cst_44 = arith.constant 2.000000e+00 : f32
    %152 = vector.broadcast %cst_44 : f32 to vector<8x32xf32>
    %153 = arith.mulf %152, %151 : vector<8x32xf32>
    %cst_45 = arith.constant 1.000000e+00 : f32
    %154 = vector.broadcast %cst_45 : f32 to vector<8x32xf32>
    %155 = arith.subf %153, %154 : vector<8x32xf32>
    %156 = vector.extract_strided_slice %148 {offsets = [0, 96], sizes = [8, 32], strides = [1, 1]} : vector<8x128xf32> to vector<8x32xf32>
    %157 = arith.mulf %150, %137 : vector<8x32xf32>
    %158 = arith.mulf %149, %155 : vector<8x32xf32>
    %159 = arith.addf %157, %158 : vector<8x32xf32>
    %160 = math.tanh %159 : vector<8x32xf32>
    %161 = arith.mulf %156, %160 : vector<8x32xf32>
    %c48 = arith.constant 48 : index
    %c0_46 = arith.constant 0 : index
    %162 = vector.load %arg4[%c48, %c0_46] : memref<64x32xf32, #tpu.memory_space<vmem>>, vector<8x32xf32>
    tpu.vector_store %arg4[%c48, %c0_46], %161 {strides = array<i32>} : memref<64x32xf32, #tpu.memory_space<vmem>>, vector<8x32xf32>,
    %163 = vector.extract_strided_slice %6 {offsets = [56, 0], sizes = [8, 128], strides = [1, 1]} : vector<64x128xf32> to vector<8x128xf32>
    %cst_47 = arith.constant dense<0.000000e+00> : vector<8x128xf32>
    %164 = tpu.matmul %161, %1, %cst_47 {dimension_numbers = #tpu.dot_dimension_numbers<[1], [0], [0], [1], [0, 0, 1, 1], [], []>} : vector<8x32xf32>, vector<32x128xf32>, vector<8x128xf32> -> vector<8x128xf32>
    %165 = arith.addf %163, %164 : vector<8x128xf32>
    %166 = arith.negf %165 : vector<8x128xf32>
    %167 = math.exp %166 : vector<8x128xf32>
    %cst_48 = arith.constant 1.000000e+00 : f32
    %168 = vector.broadcast %cst_48 : f32 to vector<8x128xf32>
    %169 = arith.addf %168, %167 : vector<8x128xf32>
    %170 = arith.divf %168, %169 : vector<8x128xf32>
    %171 = vector.extract_strided_slice %170 {offsets = [0, 0], sizes = [8, 32], strides = [1, 1]} : vector<8x128xf32> to vector<8x32xf32>
    %172 = vector.extract_strided_slice %170 {offsets = [0, 32], sizes = [8, 32], strides = [1, 1]} : vector<8x128xf32> to vector<8x32xf32>
    %173 = vector.extract_strided_slice %170 {offsets = [0, 64], sizes = [8, 32], strides = [1, 1]} : vector<8x128xf32> to vector<8x32xf32>
    %cst_49 = arith.constant 2.000000e+00 : f32
    %174 = vector.broadcast %cst_49 : f32 to vector<8x32xf32>
    %175 = arith.mulf %174, %173 : vector<8x32xf32>
    %cst_50 = arith.constant 1.000000e+00 : f32
    %176 = vector.broadcast %cst_50 : f32 to vector<8x32xf32>
    %177 = arith.subf %175, %176 : vector<8x32xf32>
    %178 = vector.extract_strided_slice %170 {offsets = [0, 96], sizes = [8, 32], strides = [1, 1]} : vector<8x128xf32> to vector<8x32xf32>
    %179 = arith.mulf %172, %159 : vector<8x32xf32>
    %180 = arith.mulf %171, %177 : vector<8x32xf32>
    %181 = arith.addf %179, %180 : vector<8x32xf32>
    %182 = math.tanh %181 : vector<8x32xf32>
    %183 = arith.mulf %178, %182 : vector<8x32xf32>
    %c56 = arith.constant 56 : index
    %c0_51 = arith.constant 0 : index
    %184 = vector.load %arg4[%c56, %c0_51] : memref<64x32xf32, #tpu.memory_space<vmem>>, vector<8x32xf32>
    tpu.vector_store %arg4[%c56, %c0_51], %183 {strides = array<i32>} : memref<64x32xf32, #tpu.memory_space<vmem>>, vector<8x32xf32>,
    %c0_52 = arith.constant 0 : index
    %c0_53 = arith.constant 0 : index
    %185 = vector.load %arg4[%c0_52, %c0_53] : memref<64x32xf32, #tpu.memory_space<vmem>>, vector<64x32xf32>
    %cst_54 = arith.constant dense<0.000000e+00> : vector<64x128xf32>
    %186 = tpu.matmul %185, %2, %cst_54 {dimension_numbers = #tpu.dot_dimension_numbers<[1], [0], [0], [1], [0, 0, 1, 1], [], []>} : vector<64x32xf32>, vector<32x128xf32>, vector<64x128xf32> -> vector<64x128xf32>
    %187 = vector.broadcast %3 : vector<1x128xf32> to vector<64x128xf32>
    %188 = arith.addf %186, %187 : vector<64x128xf32>
    %c0_55 = arith.constant 0 : index
    %c0_56 = arith.constant 0 : index
    %c0_57 = arith.constant 0 : index
    %189 = vector.load %arg3[%c0_55, %c0_56, %c0_57] : memref<1x64x128xf32, #tpu.memory_space<vmem>>, vector<1x64x128xf32>
    %190 = vector.shape_cast %189 : vector<1x64x128xf32> to vector<64x128xf32>
    %191 = vector.shape_cast %188 : vector<64x128xf32> to vector<1x64x128xf32>
    tpu.vector_store %arg3[%c0_55, %c0_56, %c0_57], %191 {strides = array<i32>} : memref<1x64x128xf32, #tpu.memory_space<vmem>>, vector<1x64x128xf32>,
    return
  }
  func.func @transform_0(%arg0: i32) -> (i32, i32, i32) {
    %c0_i32 = arith.constant 0 : i32
    %c0_i32_0 = arith.constant 0 : i32
    %c0_i32_1 = arith.constant 0 : i32
    return %arg0, %c0_i32, %c0_i32_0 : i32, i32, i32
  }
  func.func @transform_1(%arg0: i32) -> (i32, i32) {
    %c0_i32 = arith.constant 0 : i32
    %c0_i32_0 = arith.constant 0 : i32
    %c0_i32_1 = arith.constant 0 : i32
    return %c0_i32, %c0_i32_0 : i32, i32
  }
  func.func @transform_2(%arg0: i32) -> (i32, i32, i32) {
    %c0_i32 = arith.constant 0 : i32
    %c0_i32_0 = arith.constant 0 : i32
    %c0_i32_1 = arith.constant 0 : i32
    return %arg0, %c0_i32, %c0_i32_0 : i32, i32, i32
  }
}

</mosaic_0001>

<bundles_post_ra>
// kernel: _forward.1
= control target key start
LH: loop header
LB: loop body
LE: loop exit
PB: predicated region body
PF: predicated region fallthrough
CT: control target
= control target key end

     0   :  { %vm29_vm0 = vcmask 64512   ;;  %v807_v7 = vmov 0.0   ;;  %s808_s23 = smov 64   ;;  %s809_s24 = smov 32   ;;  %vm95_vm5 = vcmask 261120   ;;  %s1023_s1 = inlined_call_operand.vmem [shape: f32[80,128], index: 1, kind: input, shape index: {}]   ;;  %s1024_s0 = inlined_call_operand.vmem [shape: f32[1,64,8], index: 0, kind: input, shape index: {}]   ;;  %s1025_s2 = inlined_call_operand.vmem [shape: f32[1,64,128], index: 2, kind: output, shape index: {}]  }
   0x1   :  { %v11_v0 = vld [vmem:[%s1023_s1] sm:$0xff]  ;;  %v28_v1 = vld [vmem:[%s1024_s0 + $0x38] sm:$0xff]  ;;  %v851_v5 = vld [vmem:[%s1023_s1 + $0x10] sm:$0xff] }
   0x2   :  { %v834_v2 = vld [vmem:[%s1023_s1 + $0x20] sm:$0xff]  ;;  %750 = vmatpush.msra.mxu2 %v11_v0  ;;  %69 = vmatpush.msra.mxu0 %v11_v0  ;;  %v840_v3 = vld [vmem:[%s1023_s1 + $0x18] sm:$0xff]  ;;  %v859_v6 = vld [vmem:[%s1023_s1 + $0x8] sm:$0xff] }
   0x3   :  { %718 = vmatmul.msk.f32.vlgmr.msra.gmra.mxu2 %vm29_vm0, %v28_v1  ;;  %v21_v4 = vld [vmem:[%s1024_s0] sm:$0xff]  ;;  %243 = vmatpush.msra.mxu3 %v834_v2  ;;  %v22_v35 = vld [vmem:[%s1024_s0 + $0x8] sm:$0xff]  ;;  %v23_v63 = vld [vmem:[%s1024_s0 + $0x10] sm:$0xff] }
   0x4   :  { %111 = vmatpush.msrb.mxu2 %v834_v2  ;;  %711 = vmatmul.msk.f32.vlgmr.msra.gmra.mxu0 %vm29_vm0, %v21_v4 }
   0x5   :  { %244 = vmatpush.msra.mxu3 %v840_v3  ;;  %309 = vmatpush.msra.mxu1 %v834_v2 }
   0x6   :  { %112 = vmatpush.msrb.mxu2 %v840_v3 }
   0x7   :  { %245 = vmatpush.msra.mxu3 %v851_v5  ;;  %310 = vmatpush.msra.mxu1 %v840_v3 }
   0x8   :  { %113 = vmatpush.msrb.mxu2 %v851_v5 }
   0x9   :  { %246 = vmatpush.msra.mxu3 %v859_v6  ;;  %311 = vmatpush.msra.mxu1 %v851_v5 }
   0xa   :  { %114 = vmatpush.msrb.mxu2 %v859_v6 }
   0xb   :  { %441 = vmatpush.msrb.mxu3 %v834_v2  ;;  %115 = vmatmul.f32.vlgmr.msrb.gmra.mxu2 %v807_v7 }
   0xc   :  { %312 = vmatpush.msra.mxu1 %v859_v6  ;;  %177 = vmatpush.msra.mxu2 %v834_v2 }
   0xd   :  { %442 = vmatpush.msrb.mxu3 %v840_v3  ;;  %712 = vmatmul.msk.f32.gmra.mxu0 %vm29_vm0, %v22_v35 }
   0xe   :  { %507 = vmatpush.msrb.mxu1 %v834_v2  ;;  %178 = vmatpush.msra.mxu2 %v840_v3 }
   0xf   :  { %443 = vmatpush.msrb.mxu3 %v851_v5 }
  0x10   :  { %508 = vmatpush.msrb.mxu1 %v840_v3  ;;  %179 = vmatpush.msra.mxu2 %v851_v5 }
  0x11   :  { %444 = vmatpush.msrb.mxu3 %v859_v6 }
  0x12   :  { %509 = vmatpush.msrb.mxu1 %v851_v5  ;;  %180 = vmatpush.msra.mxu2 %v859_v6 }
  0x14   :  { %375 = vmatpush.msrb.mxu2 %v834_v2  ;;  %510 = vmatpush.msrb.mxu1 %v859_v6 }
  0x15   :  { %713 = vmatmul.msk.f32.gmra.mxu0 %vm29_vm0, %v23_v63 }
  0x16   :  { %376 = vmatpush.msrb.mxu2 %v840_v3 }
  0x18   :  { %377 = vmatpush.msrb.mxu2 %v851_v5 }
  0x1a   :  { %378 = vmatpush.msrb.mxu2 %v859_v6 }
  0x81   :  { %v71_v9 = vpop.f32.mrf.mxu0 }
  0x86   :  { %v884_v8 = vpop.f32.mrf.mxu2 }
  0x8a   :  { %v74_v37 = vpop.f32.mrf.mxu0 }
  0x8e   :  { %v116_v10 = vpop.f32.mrf.mxu2 }
  0x8f   :  { %v119_v11 = vadd.f32 %v116_v10, %v71_v9 }
  0x91   :  { %v719_v12 = vmul.f32 -1.442695, %v119_v11 }
  0x92   :  { %v77_v1 = vpop.f32.mrf.mxu0 }
  0x93   :  { %759 = vpow2.f32 %v719_v12 }
  0x99   :  { %v760_v13 = vpop.eup %759 }
  0x9a   :  { %v123_v14 = vadd.f32 1.0, %v760_v13 }
  0x9c   :  { %761 = vrcp.f32 %v123_v14  ;;  %v135_v18 = vand.u32 2147483648, %v123_v14  ;;  %v133_v20 = vand.u32 2147483647, %v123_v14  ;;  %vm129_vm2 = vweird.f32 %v123_v14 }
  0x9e   :  { %v136_v22 = vor.u32 1.1754944e-38, %v135_v18  ;;  %vm134_vm4 = vcmp.eq.f32.partialorder %v133_v20, 8.507059e+37 }
  0xa2   :  { %v762_v15 = vpop.eup %761 }
  0xa3   :  { %v125_v16 = vmul.f32 %v762_v15, %v123_v14  ;;  %vm130_vm1 = vweird.f32 %v762_v15 }
  0xa4   :  { %vm131_vm3 = vmor %vm129_vm2, %vm130_vm1 }
  0xa5   :  { %v126_v17 = vsub.f32 1.0, %v125_v16 }
  0xa7   :  { %v127_v19 = vmul.f32 %v762_v15, %v126_v17 }
  0xa9   :  { %v128_v21 = vadd.f32 %v762_v15, %v127_v19 }
  0xab   :  { %v132_v23 = vsel %vm131_vm3, %v762_v15, %v128_v21 }
  0xac   :  { %v137_v24 = vsel %vm134_vm4, %v136_v22, %v132_v23 }
  0xad   :  { %v139_v25 = vmul.f32 2.0, %v137_v24  ;;  %v141_v29 = vmul.f32 0.0, %v137_v24 }
  0xaf   :  { %v720_v26 = vadd.f32 -1.0, %v139_v25 }
  0xb1   :  { %143 = vrot.lane.b32.xlu0 %v720_v26, %s808_s23 }
 0x123   :  { %v144_v27 = vpop.permute.xlu0 %143 }
 0x124   :  { %v146_v28 = vmul.f32 %v144_v27, %v137_v24 }
 0x126   :  { %148 = vrot.lane.b32.xlu0 %v146_v28, %s809_s24  ;;  %v24_v28 = vld [vmem:[%s1024_s0 + $0x18] sm:$0xff] }
 0x127   :  { %714 = vmatmul.msk.f32.gmra.mxu0 %vm29_vm0, %v24_v28 }
 0x198   :  { %v149_v30 = vpop.permute.xlu0 %148 }
 0x199   :  { %v151_v31 = vadd.f32 %v149_v30, %v141_v29 }
 0x19b   :  { %763 = vtanh.f32 %v151_v31 }
 0x1a1   :  { %v764_v32 = vpop.eup %763 }
 0x1a2   :  { %154 = vrot.lane.b32.xlu1 %v764_v32, %s808_s23 }
 0x1a4   :  { %v80_v30 = vpop.f32.mrf.mxu0 }
 0x214   :  { %v155_v33 = vpop.permute.xlu1 %154 }
 0x215   :  { %v157_v34 = vmul.f32 %v155_v33, %v137_v24 }
 0x217   :  { %159 = vrot.lane.b32.xlu1 %v157_v34, %s809_s24 }
 0x289   :  { %v160_v36 = vpop.permute.xlu1 %159 }
 0x28a   :  { %162 = vst.msk [vmem:[#allocation2] sm:$0xff] %vm95_vm5, %v160_v36  ;;  %721 = vmatmul.msk.f32.vlgmr.msra.gmra.mxu2 %vm95_vm5, %v160_v36 }
 0x28b   :  { %573 = vmatpush.msra.mxu2 %v834_v2 }
 0x28d   :  { %574 = vmatpush.msra.mxu2 %v840_v3 }
 0x28f   :  { %575 = vmatpush.msra.mxu2 %v851_v5 }
 0x291   :  { %576 = vmatpush.msra.mxu2 %v859_v6 }
 0x30d   :  { %v182_v38 = vpop.f32.mrf.mxu2 }
 0x30e   :  { %v185_v39 = vadd.f32 %v182_v38, %v74_v37 }
 0x310   :  { %v722_v40 = vmul.f32 -1.442695, %v185_v39 }
 0x312   :  { %765 = vpow2.f32 %v722_v40 }
 0x318   :  { %v766_v41 = vpop.eup %765 }
 0x319   :  { %v189_v42 = vadd.f32 1.0, %v766_v41 }
 0x31b   :  { %767 = vrcp.f32 %v189_v42  ;;  %v201_v46 = vand.u32 2147483648, %v189_v42  ;;  %v199_v48 = vand.u32 2147483647, %v189_v42  ;;  %vm195_vm7 = vweird.f32 %v189_v42 }
 0x31d   :  { %v202_v50 = vor.u32 1.1754944e-38, %v201_v46  ;;  %vm200_vm9 = vcmp.eq.f32.partialorder %v199_v48, 8.507059e+37 }
 0x321   :  { %v768_v43 = vpop.eup %767 }
 0x322   :  { %v191_v44 = vmul.f32 %v768_v43, %v189_v42  ;;  %vm196_vm6 = vweird.f32 %v768_v43 }
 0x323   :  { %vm197_vm8 = vmor %vm195_vm7, %vm196_vm6 }
 0x324   :  { %v192_v45 = vsub.f32 1.0, %v191_v44 }
 0x326   :  { %v193_v47 = vmul.f32 %v768_v43, %v192_v45 }
 0x328   :  { %v194_v49 = vadd.f32 %v768_v43, %v193_v47 }
 0x32a   :  { %v198_v51 = vsel %vm197_vm8, %v768_v43, %v194_v49 }
 0x32b   :  { %v203_v52 = vsel %vm200_vm9, %v202_v50, %v198_v51 }
 0x32c   :  { %v205_v53 = vmul.f32 2.0, %v203_v52  ;;  %v207_v57 = vmul.f32 %v203_v52, %v151_v31 }
 0x32e   :  { %v723_v54 = vadd.f32 -1.0, %v205_v53 }
 0x330   :  { %209 = vrot.lane.b32.xlu2 %v723_v54, %s808_s23 }
 0x38a   :  { %v210_v55 = vpop.permute.xlu2 %209 }
 0x38b   :  { %v212_v56 = vmul.f32 %v210_v55, %v203_v52 }
 0x38d   :  { %214 = vrot.lane.b32.xlu2 %v212_v56, %s809_s24  ;;  %v25_v56 = vld [vmem:[%s1024_s0 + $0x20] sm:$0xff] }
 0x38e   :  { %715 = vmatmul.msk.f32.gmra.mxu0 %vm29_vm0, %v25_v56 }
 0x3e7   :  { %v215_v58 = vpop.permute.xlu2 %214 }
 0x3e8   :  { %v217_v59 = vadd.f32 %v215_v58, %v207_v57 }
 0x3ea   :  { %769 = vtanh.f32 %v217_v59 }
 0x3f0   :  { %v770_v60 = vpop.eup %769 }
 0x3f1   :  { %220 = vrot.lane.b32.xlu0 %v770_v60, %s808_s23 }
 0x40b   :  { %v83_v58 = vpop.f32.mrf.mxu0 }
 0x463   :  { %v221_v61 = vpop.permute.xlu0 %220 }
 0x464   :  { %v223_v62 = vmul.f32 %v221_v61, %v203_v52 }
 0x466   :  { %225 = vrot.lane.b32.xlu1 %v223_v62, %s809_s24 }
 0x4d8   :  { %v226_v0 = vpop.permute.xlu1 %225 }
 0x4d9   :  { %228 = vst.msk [vmem:[#allocation2 + $0x8] sm:$0xff] %vm95_vm5, %v226_v0  ;;  %724 = vmatmul.msk.f32.vlgmr.msra.gmra.mxu3 %vm95_vm5, %v226_v0 }
 0x55c   :  { %v248_v2 = vpop.f32.mrf.mxu3 }
 0x55d   :  { %v251_v3 = vadd.f32 %v248_v2, %v77_v1 }
 0x55f   :  { %v725_v4 = vmul.f32 -1.442695, %v251_v3 }
 0x561   :  { %771 = vpow2.f32 %v725_v4 }
 0x567   :  { %v772_v5 = vpop.eup %771 }
 0x568   :  { %v255_v6 = vadd.f32 1.0, %v772_v5 }
 0x56a   :  { %773 = vrcp.f32 %v255_v6  ;;  %v267_v11 = vand.u32 2147483648, %v255_v6  ;;  %v265_v13 = vand.u32 2147483647, %v255_v6  ;;  %vm261_vm11 = vweird.f32 %v255_v6 }
 0x56c   :  { %v268_v15 = vor.u32 1.1754944e-38, %v267_v11  ;;  %vm266_vm13 = vcmp.eq.f32.partialorder %v265_v13, 8.507059e+37 }
 0x570   :  { %v774_v7 = vpop.eup %773 }
 0x571   :  { %v257_v9 = vmul.f32 %v774_v7, %v255_v6  ;;  %vm262_vm10 = vweird.f32 %v774_v7 }
 0x572   :  { %vm263_vm12 = vmor %vm261_vm11, %vm262_vm10 }
 0x573   :  { %v258_v10 = vsub.f32 1.0, %v257_v9 }
 0x575   :  { %v259_v12 = vmul.f32 %v774_v7, %v258_v10 }
 0x577   :  { %v260_v14 = vadd.f32 %v774_v7, %v259_v12 }
 0x579   :  { %v264_v16 = vsel %vm263_vm12, %v774_v7, %v260_v14 }
 0x57a   :  { %v269_v17 = vsel %vm266_vm13, %v268_v15, %v264_v16 }
 0x57b   :  { %v271_v18 = vmul.f32 2.0, %v269_v17  ;;  %v273_v22 = vmul.f32 %v269_v17, %v217_v59 }
 0x57d   :  { %v726_v19 = vadd.f32 -1.0, %v271_v18 }
 0x57f   :  { %275 = vrot.lane.b32.xlu2 %v726_v19, %s808_s23 }
 0x5d9   :  { %v276_v20 = vpop.permute.xlu2 %275 }
 0x5da   :  { %v278_v21 = vmul.f32 %v276_v20, %v269_v17 }
 0x5dc   :  { %280 = vrot.lane.b32.xlu0 %v278_v21, %s809_s24  ;;  %v19_v21 = vld [vmem:[%s1023_s1 + $0x40] sm:$0xff] }
 0x5dd   :  { %751 = vmatpush.msra.mxu3 %v19_v21 }
 0x64e   :  { %v281_v23 = vpop.permute.xlu0 %280 }
 0x64f   :  { %v283_v24 = vadd.f32 %v281_v23, %v273_v22  ;;  %v18_v22 = vld [vmem:[%s1023_s1 + $0x38] sm:$0xff]  ;;  %v26_v23 = vld [vmem:[%s1024_s0 + $0x28] sm:$0xff] }
 0x650   :  { %716 = vmatmul.msk.f32.gmra.mxu0 %vm29_vm0, %v26_v23  ;;  %752 = vmatpush.msra.mxu3 %v18_v22 }
 0x651   :  { %775 = vtanh.f32 %v283_v24 }
 0x657   :  { %v776_v25 = vpop.eup %775 }
 0x658   :  { %286 = vrot.lane.b32.xlu1 %v776_v25, %s808_s23  ;;  %v16_v25 = vld [vmem:[%s1023_s1 + $0x28] sm:$0xff] }
 0x6ca   :  { %v287_v26 = vpop.permute.xlu1 %286 }
 0x6cb   :  { %v289_v27 = vmul.f32 %v287_v26, %v269_v17 }
 0x6cd   :  { %291 = vrot.lane.b32.xlu2 %v289_v27, %s809_s24  ;;  %v86_v28 = vpop.f32.mrf.mxu0 }
 0x727   :  { %v292_v29 = vpop.permute.xlu2 %291 }
 0x728   :  { %294 = vst.msk [vmem:[#allocation2 + $0x10] sm:$0xff] %vm95_vm5, %v292_v29  ;;  %727 = vmatmul.msk.f32.vlgmr.msra.gmra.mxu1 %vm95_vm5, %v292_v29 }
 0x729   :  { %670 = vmatpush.msra.mxu1 %v19_v21 }
 0x72b   :  { %671 = vmatpush.msra.mxu1 %v18_v22 }
 0x7a5   :  { %v314_v31 = vpop.f32.mrf.mxu1 }
 0x7a6   :  { %v317_v32 = vadd.f32 %v314_v31, %v80_v30 }
 0x7a8   :  { %v728_v33 = vmul.f32 -1.442695, %v317_v32  ;;  %v956_v32 = vld [vmem:[%s1023_s1 + $0x48] ss:$0 sm:$0xff] }
 0x7aa   :  { %777 = vpow2.f32 %v728_v33 }
 0x7b0   :  { %v778_v34 = vpop.eup %777 }
 0x7b1   :  { %v321_v35 = vadd.f32 1.0, %v778_v34 }
 0x7b3   :  { %779 = vrcp.f32 %v321_v35  ;;  %v333_v39 = vand.u32 2147483648, %v321_v35  ;;  %v331_v41 = vand.u32 2147483647, %v321_v35  ;;  %vm327_vm15 = vweird.f32 %v321_v35 }
 0x7b5   :  { %v334_v43 = vor.u32 1.1754944e-38, %v333_v39  ;;  %vm332_vm2 = vcmp.eq.f32.partialorder %v331_v41, 8.507059e+37 }
 0x7b9   :  { %v780_v36 = vpop.eup %779 }
 0x7ba   :  { %v323_v37 = vmul.f32 %v780_v36, %v321_v35  ;;  %vm328_vm14 = vweird.f32 %v780_v36 }
 0x7bb   :  { %vm329_vm1 = vmor %vm327_vm15, %vm328_vm14 }
 0x7bc   :  { %v324_v38 = vsub.f32 1.0, %v323_v37 }
 0x7be   :  { %v325_v40 = vmul.f32 %v780_v36, %v324_v38 }
 0x7c0   :  { %v326_v42 = vadd.f32 %v780_v36, %v325_v40 }
 0x7c2   :  { %v330_v44 = vsel %vm329_vm1, %v780_v36, %v326_v42 }
 0x7c3   :  { %v335_v45 = vsel %vm332_vm2, %v334_v43, %v330_v44 }
 0x7c4   :  { %v337_v46 = vmul.f32 2.0, %v335_v45  ;;  %v339_v50 = vmul.f32 %v335_v45, %v283_v24  ;;  %v17_v24 = vld [vmem:[%s1023_s1 + $0x30] sm:$0xff] }
 0x7c5   :  { %753 = vmatpush.msra.mxu3 %v17_v24  ;;  %672 = vmatpush.msra.mxu1 %v17_v24 }
 0x7c6   :  { %v729_v47 = vadd.f32 -1.0, %v337_v46 }
 0x7c7   :  { %754 = vmatpush.msra.mxu3 %v16_v25  ;;  %673 = vmatpush.msra.mxu1 %v16_v25 }
 0x7c8   :  { %341 = vrot.lane.b32.xlu0 %v729_v47, %s808_s23 }
 0x83a   :  { %v342_v48 = vpop.permute.xlu0 %341 }
 0x83b   :  { %v344_v49 = vmul.f32 %v342_v48, %v335_v45 }
 0x83d   :  { %346 = vrot.lane.b32.xlu1 %v344_v49, %s809_s24 }
 0x8af   :  { %v347_v51 = vpop.permute.xlu1 %346 }
 0x8b0   :  { %v349_v52 = vadd.f32 %v347_v51, %v339_v50 }
 0x8b2   :  { %781 = vtanh.f32 %v349_v52 }
 0x8b8   :  { %v782_v53 = vpop.eup %781 }
 0x8b9   :  { %352 = vrot.lane.b32.xlu2 %v782_v53, %s808_s23 }
 0x913   :  { %v353_v54 = vpop.permute.xlu2 %352 }
 0x914   :  { %v355_v55 = vmul.f32 %v353_v54, %v335_v45 }
 0x916   :  { %357 = vrot.lane.b32.xlu0 %v355_v55, %s809_s24 }
 0x988   :  { %v358_v57 = vpop.permute.xlu0 %357 }
 0x989   :  { %360 = vst.msk [vmem:[#allocation2 + $0x18] sm:$0xff] %vm95_vm5, %v358_v57  ;;  %730 = vmatmul.msk.f32.vlgmr.msrb.gmra.mxu2 %vm95_vm5, %v358_v57  ;;  %v27_v57 = vld [vmem:[%s1024_s0 + $0x30] sm:$0xff] }
 0x98a   :  { %717 = vmatmul.msk.f32.gmra.mxu0 %vm29_vm0, %v27_v57 }
 0xa0c   :  { %v380_v59 = vpop.f32.mrf.mxu2 }
 0xa0d   :  { %v383_v60 = vadd.f32 %v380_v59, %v83_v58  ;;  %v625_v59 = vld [vmem:[#allocation2] sm:$0xff] }
 0xa0f   :  { %v731_v61 = vmul.f32 -1.442695, %v383_v60 }
 0xa11   :  { %783 = vpow2.f32 %v731_v61  ;;  %v626_v61 = vld [vmem:[#allocation2 + $0x8] sm:$0xff] }
 0xa17   :  { %v784_v62 = vpop.eup %783 }
 0xa18   :  { %v387_v63 = vadd.f32 1.0, %v784_v62  ;;  %v627_v62 = vld [vmem:[#allocation2 + $0x10] sm:$0xff] }
 0xa1a   :  { %785 = vrcp.f32 %v387_v63  ;;  %v399_v3 = vand.u32 2147483648, %v387_v63  ;;  %v397_v5 = vand.u32 2147483647, %v387_v63  ;;  %vm393_vm4 = vweird.f32 %v387_v63 }
 0xa1c   :  { %v400_v7 = vor.u32 1.1754944e-38, %v399_v3  ;;  %vm398_vm7 = vcmp.eq.f32.partialorder %v397_v5, 8.507059e+37 }
 0xa20   :  { %v786_v0 = vpop.eup %785 }
 0xa21   :  { %v389_v1 = vmul.f32 %v786_v0, %v387_v63  ;;  %vm394_vm3 = vweird.f32 %v786_v0  ;;  %v628_v63 = vld [vmem:[#allocation2 + $0x18] sm:$0xff] }
 0xa22   :  { %vm395_vm6 = vmor %vm393_vm4, %vm394_vm3 }
 0xa23   :  { %v390_v2 = vsub.f32 1.0, %v389_v1 }
 0xa25   :  { %v391_v4 = vmul.f32 %v786_v0, %v390_v2 }
 0xa27   :  { %v392_v6 = vadd.f32 %v786_v0, %v391_v4 }
 0xa29   :  { %v396_v9 = vsel %vm395_vm6, %v786_v0, %v392_v6  ;;  %v89_v0 = vpop.f32.mrf.mxu0 }
 0xa2a   :  { %v401_v10 = vsel %vm398_vm7, %v400_v7, %v396_v9 }
 0xa2b   :  { %v403_v11 = vmul.f32 2.0, %v401_v10  ;;  %v405_v15 = vmul.f32 %v401_v10, %v349_v52 }
 0xa2d   :  { %v732_v12 = vadd.f32 -1.0, %v403_v11 }
 0xa2f   :  { %407 = vrot.lane.b32.xlu1 %v732_v12, %s808_s23 }
 0xaa1   :  { %v408_v13 = vpop.permute.xlu1 %407 }
 0xaa2   :  { %v410_v14 = vmul.f32 %v408_v13, %v401_v10 }
 0xaa4   :  { %412 = vrot.lane.b32.xlu2 %v410_v14, %s809_s24 }
 0xafe   :  { %v413_v16 = vpop.permute.xlu2 %412 }
 0xaff   :  { %v415_v17 = vadd.f32 %v413_v16, %v405_v15 }
 0xb01   :  { %787 = vtanh.f32 %v415_v17 }
 0xb07   :  { %v788_v18 = vpop.eup %787 }
 0xb08   :  { %418 = vrot.lane.b32.xlu0 %v788_v18, %s808_s23 }
 0xb7a   :  { %v419_v19 = vpop.permute.xlu0 %418 }
 0xb7b   :  { %v421_v20 = vmul.f32 %v419_v19, %v401_v10 }
 0xb7d   :  { %423 = vrot.lane.b32.xlu1 %v421_v20, %s809_s24 }
 0xbef   :  { %v424_v26 = vpop.permute.xlu1 %423 }
 0xbf0   :  { %426 = vst.msk [vmem:[#allocation2 + $0x20] sm:$0xff] %vm95_vm5, %v424_v26  ;;  %733 = vmatmul.msk.f32.vlgmr.msrb.gmra.mxu3 %vm95_vm5, %v424_v26 }
 0xbf7   :  { %v629_v27 = vld [vmem:[#allocation2 + $0x20] sm:$0xff] }
 0xbf8   :  { %746 = vmatmul.msk.f32.vlgmr.msra.gmra.mxu3 %vm95_vm5, %v629_v27 }
 0xc73   :  { %v446_v29 = vpop.f32.mrf.mxu3 }
 0xc74   :  { %v449_v30 = vadd.f32 %v446_v29, %v86_v28 }
 0xc76   :  { %v734_v31 = vmul.f32 -1.442695, %v449_v30 }
 0xc78   :  { %789 = vpow2.f32 %v734_v31 }
 0xc7b   :  { %v687_v33 = vpop.f32.mrf.mxu3 }
 0xc7c   :  { %v688_v34 = vadd.f32 %v956_v32, %v687_v33 }
 0xc7e   :  { %v790_v35 = vpop.eup %789  ;;  %703 = vst [vmem:[%s1025_s2 + $0x20] sm:$0xff] %v688_v34 }
 0xc7f   :  { %v453_v36 = vadd.f32 1.0, %v790_v35 }
 0xc81   :  { %791 = vrcp.f32 %v453_v36  ;;  %v465_v40 = vand.u32 2147483648, %v453_v36  ;;  %v463_v42 = vand.u32 2147483647, %v453_v36  ;;  %vm459_vm9 = vweird.f32 %v453_v36 }
 0xc83   :  { %v466_v44 = vor.u32 1.1754944e-38, %v465_v40  ;;  %vm464_vm11 = vcmp.eq.f32.partialorder %v463_v42, 8.507059e+37 }
 0xc87   :  { %v792_v37 = vpop.eup %791 }
 0xc88   :  { %v455_v38 = vmul.f32 %v792_v37, %v453_v36  ;;  %vm460_vm8 = vweird.f32 %v792_v37 }
 0xc89   :  { %vm461_vm10 = vmor %vm459_vm9, %vm460_vm8 }
 0xc8a   :  { %v456_v39 = vsub.f32 1.0, %v455_v38 }
 0xc8c   :  { %v457_v41 = vmul.f32 %v792_v37, %v456_v39 }
 0xc8e   :  { %v458_v43 = vadd.f32 %v792_v37, %v457_v41 }
 0xc90   :  { %v462_v45 = vsel %vm461_vm10, %v792_v37, %v458_v43 }
 0xc91   :  { %v467_v46 = vsel %vm464_vm11, %v466_v44, %v462_v45 }
 0xc92   :  { %v469_v47 = vmul.f32 2.0, %v467_v46  ;;  %v471_v51 = vmul.f32 %v467_v46, %v415_v17 }
 0xc94   :  { %v735_v48 = vadd.f32 -1.0, %v469_v47 }
 0xc96   :  { %473 = vrot.lane.b32.xlu2 %v735_v48, %s808_s23 }
 0xcf0   :  { %v474_v49 = vpop.permute.xlu2 %473 }
 0xcf1   :  { %v476_v50 = vmul.f32 %v474_v49, %v467_v46 }
 0xcf3   :  { %478 = vrot.lane.b32.xlu0 %v476_v50, %s809_s24 }
 0xd65   :  { %v479_v52 = vpop.permute.xlu0 %478 }
 0xd66   :  { %v964_v53 = vadd.f32 %v479_v52, %v471_v51 }
 0xd68   :  { %793 = vtanh.f32 %v964_v53 }
 0xd6e   :  { %v794_v54 = vpop.eup %793 }
 0xd6f   :  { %484 = vrot.lane.b32.xlu1 %v794_v54, %s808_s23 }
 0xde1   :  { %v485_v55 = vpop.permute.xlu1 %484 }
 0xde2   :  { %v487_v56 = vmul.f32 %v485_v55, %v467_v46 }
 0xde4   :  { %489 = vrot.lane.b32.xlu2 %v487_v56, %s809_s24 }
 0xe3e   :  { %v490_v58 = vpop.permute.xlu2 %489 }
 0xe3f   :  { %492 = vst.msk [vmem:[#allocation2 + $0x28] sm:$0xff] %vm95_vm5, %v490_v58  ;;  %736 = vmatmul.msk.f32.vlgmr.msrb.gmra.mxu1 %vm95_vm5, %v490_v58 }
 0xe46   :  { %v630_v60 = vld [vmem:[#allocation2 + $0x28] sm:$0xff] }
 0xe47   :  { %742 = vmatmul.msk.f32.vlgmr.msra.gmra.mxu1 %vm95_vm5, %v625_v59  ;;  %747 = vmatmul.msk.f32.gmra.mxu3 %vm95_vm5, %v630_v60 }
 0xe4f   :  { %743 = vmatmul.msk.f32.gmra.mxu1 %vm95_vm5, %v626_v61 }
 0xe57   :  { %744 = vmatmul.msk.f32.gmra.mxu1 %vm95_vm5, %v627_v62 }
 0xe5f   :  { %745 = vmatmul.msk.f32.gmra.mxu1 %vm95_vm5, %v628_v63 }
 0xebc   :  { %v512_v1 = vpop.f32.mrf.mxu1 }
 0xebd   :  { %v515_v2 = vadd.f32 %v512_v1, %v89_v0 }
 0xebf   :  { %v737_v3 = vmul.f32 -1.442695, %v515_v2 }
 0xec1   :  { %795 = vpow2.f32 %v737_v3 }
 0xec4   :  { %v675_v4 = vpop.f32.mrf.mxu1 }
 0xec5   :  { %v676_v5 = vadd.f32 %v956_v32, %v675_v4 }
 0xec7   :  { %v796_v6 = vpop.eup %795  ;;  %699 = vst [vmem:[%s1025_s2] sm:$0xff] %v676_v5 }
 0xec8   :  { %v519_v7 = vadd.f32 1.0, %v796_v6 }
 0xeca   :  { %797 = vrcp.f32 %v519_v7  ;;  %v690_v9 = vpop.f32.mrf.mxu3  ;;  %v531_v17 = vand.u32 2147483648, %v519_v7  ;;  %v529_v20 = vand.u32 2147483647, %v519_v7  ;;  %vm525_vm12 = vweird.f32 %v519_v7 }
 0xecb   :  { %v691_v10 = vadd.f32 %v956_v32, %v690_v9 }
 0xecc   :  { %v678_v11 = vpop.f32.mrf.mxu1  ;;  %v532_v22 = vor.u32 1.1754944e-38, %v531_v17  ;;  %vm530_vm14 = vcmp.eq.f32.partialorder %v529_v20, 8.507059e+37 }
 0xecd   :  { %704 = vst [vmem:[%s1025_s2 + $0x28] sm:$0xff] %v691_v10  ;;  %v679_v12 = vadd.f32 %v956_v32, %v678_v11 }
 0xecf   :  { %700 = vst [vmem:[%s1025_s2 + $0x8] sm:$0xff] %v679_v12 }
 0xed0   :  { %v798_v13 = vpop.eup %797 }
 0xed1   :  { %v521_v14 = vmul.f32 %v798_v13, %v519_v7  ;;  %vm526_vm0 = vweird.f32 %v798_v13 }
 0xed2   :  { %vm527_vm13 = vmor %vm525_vm12, %vm526_vm0 }
 0xed3   :  { %v522_v15 = vsub.f32 1.0, %v521_v14 }
 0xed4   :  { %v681_v16 = vpop.f32.mrf.mxu1 }
 0xed5   :  { %v682_v18 = vadd.f32 %v956_v32, %v681_v16  ;;  %v523_v19 = vmul.f32 %v798_v13, %v522_v15 }
 0xed7   :  { %701 = vst [vmem:[%s1025_s2 + $0x10] sm:$0xff] %v682_v18  ;;  %v524_v21 = vadd.f32 %v798_v13, %v523_v19 }
 0xed9   :  { %v528_v23 = vsel %vm527_vm13, %v798_v13, %v524_v21 }
 0xeda   :  { %v533_v24 = vsel %vm530_vm14, %v532_v22, %v528_v23 }
 0xedb   :  { %v535_v25 = vmul.f32 2.0, %v533_v24  ;;  %v537_v31 = vmul.f32 %v533_v24, %v964_v53 }
 0xedc   :  { %v684_v26 = vpop.f32.mrf.mxu1 }
 0xedd   :  { %v685_v27 = vadd.f32 %v956_v32, %v684_v26  ;;  %v738_v28 = vadd.f32 -1.0, %v535_v25 }
 0xedf   :  { %702 = vst [vmem:[%s1025_s2 + $0x18] sm:$0xff] %v685_v27  ;;  %539 = vrot.lane.b32.xlu0 %v738_v28, %s808_s23 }
 0xf51   :  { %v540_v29 = vpop.permute.xlu0 %539 }
 0xf52   :  { %v542_v30 = vmul.f32 %v540_v29, %v533_v24 }
 0xf54   :  { %544 = vrot.lane.b32.xlu1 %v542_v30, %s809_s24 }
 0xfc6   :  { %v545_v33 = vpop.permute.xlu1 %544 }
 0xfc7   :  { %v547_v34 = vadd.f32 %v545_v33, %v537_v31 }
 0xfc9   :  { %799 = vtanh.f32 %v547_v34 }
 0xfcf   :  { %v800_v35 = vpop.eup %799 }
 0xfd0   :  { %550 = vrot.lane.b32.xlu2 %v800_v35, %s808_s23 }
0x102a   :  { %v551_v36 = vpop.permute.xlu2 %550 }
0x102b   :  { %v553_v37 = vmul.f32 %v551_v36, %v533_v24 }
0x102d   :  { %555 = vrot.lane.b32.xlu0 %v553_v37, %s809_s24 }
0x109f   :  { %v556_v38 = vpop.permute.xlu0 %555 }
0x10a0   :  { %558 = vst.msk [vmem:[#allocation2 + $0x30] sm:$0xff] %vm95_vm5, %v556_v38  ;;  %739 = vmatmul.msk.f32.vlgmr.msra.gmra.mxu2 %vm95_vm5, %v556_v38 }
0x10a7   :  { %v631_v39 = vld [vmem:[#allocation2 + $0x30] sm:$0xff] }
0x10a8   :  { %748 = vmatmul.msk.f32.gmra.mxu3 %vm95_vm5, %v631_v39 }
0x1123   :  { %v578_v40 = vpop.f32.mrf.mxu2 }
0x1124   :  { %v581_v41 = vadd.f32 %v578_v40, %v884_v8 }
0x1126   :  { %v740_v42 = vmul.f32 -1.442695, %v581_v41 }
0x1128   :  { %801 = vpow2.f32 %v740_v42 }
0x112b   :  { %v693_v43 = vpop.f32.mrf.mxu3 }
0x112c   :  { %v694_v44 = vadd.f32 %v956_v32, %v693_v43 }
0x112e   :  { %v802_v45 = vpop.eup %801  ;;  %705 = vst [vmem:[%s1025_s2 + $0x30] sm:$0xff] %v694_v44 }
0x112f   :  { %v585_v46 = vadd.f32 1.0, %v802_v45 }
0x1131   :  { %803 = vrcp.f32 %v585_v46  ;;  %v597_v50 = vand.u32 2147483648, %v585_v46  ;;  %v595_v52 = vand.u32 2147483647, %v585_v46  ;;  %vm591_vm1 = vweird.f32 %v585_v46 }
0x1133   :  { %v598_v53 = vor.u32 1.1754944e-38, %v597_v50  ;;  %vm596_vm3 = vcmp.eq.f32.partialorder %v595_v52, 8.507059e+37 }
0x1137   :  { %v804_v47 = vpop.eup %803 }
0x1138   :  { %v587_v48 = vmul.f32 %v804_v47, %v585_v46  ;;  %vm592_vm15 = vweird.f32 %v804_v47 }
0x1139   :  { %vm593_vm2 = vmor %vm591_vm1, %vm592_vm15 }
0x113a   :  { %v588_v49 = vsub.f32 1.0, %v587_v48 }
0x113c   :  { %v589_v51 = vmul.f32 %v804_v47, %v588_v49 }
0x113e   :  { %v590_v8 = vadd.f32 %v804_v47, %v589_v51 }
0x1140   :  { %v594_v54 = vsel %vm593_vm2, %v804_v47, %v590_v8 }
0x1141   :  { %v599_v55 = vsel %vm596_vm3, %v598_v53, %v594_v54 }
0x1142   :  { %v601_v56 = vmul.f32 2.0, %v599_v55  ;;  %v603_v60 = vmul.f32 %v599_v55, %v547_v34 }
0x1144   :  { %v741_v57 = vadd.f32 -1.0, %v601_v56 }
0x1146   :  { %605 = vrot.lane.b32.xlu1 %v741_v57, %s808_s23 }
0x11b8   :  { %v606_v58 = vpop.permute.xlu1 %605 }
0x11b9   :  { %v608_v59 = vmul.f32 %v606_v58, %v599_v55 }
0x11bb   :  { %610 = vrot.lane.b32.xlu2 %v608_v59, %s809_s24 }
0x1215   :  { %v611_v61 = vpop.permute.xlu2 %610 }
0x1216   :  { %v613_v62 = vadd.f32 %v611_v61, %v603_v60 }
0x1218   :  { %805 = vtanh.f32 %v613_v62 }
0x121e   :  { %v806_v63 = vpop.eup %805 }
0x121f   :  { %616 = vrot.lane.b32.xlu0 %v806_v63, %s808_s23 }
0x1291   :  { %v617_v0 = vpop.permute.xlu0 %616 }
0x1292   :  { %v619_v1 = vmul.f32 %v617_v0, %v599_v55 }
0x1294   :  { %621 = vrot.lane.b32.xlu1 %v619_v1, %s809_s24 }
0x1306   :  { %v622_v2 = vpop.permute.xlu1 %621 }
0x1307   :  { %624 = vst.msk [vmem:[#allocation2 + $0x38] sm:$0xff] %vm95_vm5, %v622_v2 }
0x130e   :  { %v632_v3 = vld [vmem:[#allocation2 + $0x38] sm:$0xff] }
0x130f   :  { %749 = vmatmul.msk.f32.gmra.mxu3 %vm95_vm5, %v632_v3 }
0x1392   :  { %v696_v4 = vpop.f32.mrf.mxu3 }
0x1393   :  { %v697_v5 = vadd.f32 %v956_v32, %v696_v4 }
0x1395   :  { %706 = vst [vmem:[%s1025_s2 + $0x38] sm:$0xff] %v697_v5 }

</bundles_post_ra>
